<compile_context>
chip_gen: v6e
topology: v6e:2x2x1
jax: 0.10.0
libtpu: 0.0.40
codegen_flags: <defaults>
</compile_context>

<pallas_src>
import functools

import jax
import jax.numpy as jnp
from jax.experimental import pallas as pl
from jax.experimental.pallas import tpu as pltpu

SUBLANE = 8
D_IN = 28 * 28      # 784
K_PAD = 896         # 7 * 128, lane-aligned input width
H1 = 128
H2 = 64
H2_PAD = 128        # hidden-2 padded to a full lane width
D_OUT = 10
OUT_PAD = 128       # output padded to a full lane width (unmasked stores)


def _round_up(x, m):
    return (x + m - 1) // m * m


def _mlp_kernel(x_ref, w1_ref, b1_ref, w2_ref, b2_ref, w3_ref, b3_ref, o_ref):
    # bf16 operands on the MXU, f32 accumulation; bias add + ReLU in f32 (VPU).
    x = x_ref[...]                                                   # (TB, 896) bf16
    h1 = jnp.dot(x, w1_ref[...], preferred_element_type=jnp.float32) + b1_ref[...]
    h1 = jnp.maximum(h1, 0.0).astype(jnp.bfloat16)                   # (TB, 128)
    h2 = jnp.dot(h1, w2_ref[...], preferred_element_type=jnp.float32) + b2_ref[...]
    h2 = jnp.maximum(h2, 0.0).astype(jnp.bfloat16)                   # (TB, 128), cols 64.. are 0
    h3 = jnp.dot(h2, w3_ref[...], preferred_element_type=jnp.float32) + b3_ref[...]
    o_ref[...] = jnp.maximum(h3, 0.0).astype(o_ref.dtype)            # (TB, 128) lane-dense


@functools.partial(jax.jit, static_argnames=("batch_tile",))
def student_net_forward(x_nchw, params, *, batch_tile=256):
    """x_nchw: (B, 1, 28, 28) float32  ->  (B, 10) float32."""
    w1, b1, w2, b2, w3, b3 = params
    B = x_nchw.shape[0]
    x = x_nchw.reshape(B, -1)                                        # flatten -> (B, 784)

    # Batch tiling: keep TB in the 128-256 range (vreg pressure), pad B to a
    # multiple of the tile (and at least the sublane width of 8).
    TB = min(batch_tile, _round_up(B, SUBLANE))
    B_pad = _round_up(B, TB)

    bf = lambda a: a.astype(jnp.bfloat16)
    # Zero-padded, lane-dense, bf16 operands; f32 biases.
    x_p = jnp.zeros((B_pad, K_PAD), jnp.bfloat16).at[:B, :D_IN].set(bf(x))
    w1_p = jnp.zeros((K_PAD, H1), jnp.bfloat16).at[:D_IN, :].set(bf(w1))
    b1_p = b1.astype(jnp.float32)                                            # (1, 128)
    w2_p = jnp.zeros((H1, H2_PAD), jnp.bfloat16).at[:, :H2].set(bf(w2))
    b2_p = jnp.zeros((1, H2_PAD), jnp.float32).at[:, :H2].set(b2)
    w3_p = jnp.zeros((H2_PAD, OUT_PAD), jnp.bfloat16).at[:H2, :D_OUT].set(bf(w3))
    b3_p = jnp.zeros((1, OUT_PAD), jnp.float32).at[:, :D_OUT].set(b3)

    grid = (B_pad // TB,)
    resident = lambda shape: pl.BlockSpec(shape, lambda i: (0, 0))   # DMA'd once, stays in VMEM

    flops = 2 * B_pad * (K_PAD * H1 + H1 * H2_PAD + H2_PAD * OUT_PAD)
    bytes_accessed = (
        x_p.size * 2
        + (w1_p.size + w2_p.size + w3_p.size) * 2
        + (b1_p.size + b2_p.size + b3_p.size) * 4
        + B_pad * OUT_PAD * 4
    )

    out = pl.pallas_call(
        _mlp_kernel,
        out_shape=jax.ShapeDtypeStruct((B_pad, OUT_PAD), jnp.float32),
        grid=grid,
        in_specs=[
            pl.BlockSpec((TB, K_PAD), lambda i: (i, 0)),             # streamed per batch tile
            resident((K_PAD, H1)),
            resident((1, H1)),
            resident((H1, H2_PAD)),
            resident((1, H2_PAD)),
            resident((H2_PAD, OUT_PAD)),
            resident((1, OUT_PAD)),
        ],
        out_specs=pl.BlockSpec((TB, OUT_PAD), lambda i: (i, 0)),
        compiler_params=pltpu.CompilerParams(
            dimension_semantics=("parallel",),                       # megacore split on v7x
            vmem_limit_bytes=32 << 20,
        ),
        cost_estimate=pl.CostEstimate(
            flops=int(flops), transcendentals=0, bytes_accessed=int(bytes_accessed)
        ),
    )(x_p, w1_p, b1_p, w2_p, b2_p, w3_p, b3_p)

    return out[:B, :D_OUT]


def init_params(key):
    """Deterministic init matching PyTorch nn.Linear default (U[-1/sqrt(fan_in), +])."""
    dims = [(D_IN, H1), (H1, H2), (H2, D_OUT)]
    params = []
    for i, (fan_in, fan_out) in enumerate(dims):
        kw, kb = jax.random.split(jax.random.fold_in(key, i))
        bound = 1.0 / jnp.sqrt(fan_in)
        w = jax.random.uniform(kw, (fan_in, fan_out), jnp.float32, -bound, bound)
        b = jax.random.uniform(kb, (1, fan_out), jnp.float32, -bound, bound)
        params += [w, b]
    return tuple(params)


def reference_forward_f32(x_nchw, params):
    w1, b1, w2, b2, w3, b3 = params
    x = x_nchw.reshape(x_nchw.shape[0], -1)
    h = jnp.maximum(x @ w1 + b1, 0.0)
    h = jnp.maximum(h @ w2 + b2, 0.0)
    return jnp.maximum(h @ w3 + b3, 0.0)


def reference_forward_bf16(x_nchw, params):
    """Mimics the kernel's bf16-operand / f32-accumulate arithmetic."""
    w1, b1, w2, b2, w3, b3 = params
    bf = lambda a: a.astype(jnp.bfloat16)
    x = bf(x_nchw.reshape(x_nchw.shape[0], -1))
    h = jnp.maximum(jnp.dot(x, bf(w1), preferred_element_type=jnp.float32) + b1, 0.0)
    h = jnp.maximum(jnp.dot(bf(h), bf(w2), preferred_element_type=jnp.float32) + b2, 0.0)
    return jnp.maximum(jnp.dot(bf(h), bf(w3), preferred_element_type=jnp.float32) + b3, 0.0)


if __name__ == "__main__":
    key = jax.random.PRNGKey(0)
    k_x, k_p = jax.random.split(key)

    B = 2
    x = jax.random.normal(k_x, (B, 1, 28, 28), jnp.float32)  # MNIST-like NCHW
    params = init_params(k_p)

    out = student_net_forward(x, params)
    out = jax.block_until_ready(out)
    assert out.shape == (B, 10), out.shape

    ref_bf16 = reference_forward_bf16(x, params)
    ref_f32 = reference_forward_f32(x, params)
    assert jnp.allclose(out, ref_bf16, atol=1e-2, rtol=1e-2), "mismatch vs bf16 reference"
    assert jnp.allclose(out, ref_f32, atol=3e-2, rtol=5e-2), "mismatch vs f32 reference"

    print("KERNEL_OK")
</pallas_src>

<mosaic_0001>
module attributes {stable_mosaic.version = 11 : i64} {
  func.func @_mlp_kernel(%arg0: i32, %arg1: memref<8x896xbf16, #tpu.memory_space<vmem>>, %arg2: memref<896x128xbf16, #tpu.memory_space<vmem>>, %arg3: memref<1x128xf32, #tpu.memory_space<vmem>>, %arg4: memref<128x128xbf16, #tpu.memory_space<vmem>>, %arg5: memref<1x128xf32, #tpu.memory_space<vmem>>, %arg6: memref<128x128xbf16, #tpu.memory_space<vmem>>, %arg7: memref<1x128xf32, #tpu.memory_space<vmem>>, %arg8: memref<8x128xf32, #tpu.memory_space<vmem>>) attributes {dimension_semantics = [#tpu.dimension_semantics<parallel>], iteration_bounds = array<i64: 1>, scalar_prefetch = 0 : i64, scratch_operands = 0 : i64, tpu.core_type = #tpu.core_type<tc>, window_params = [{transform_indices = @transform_0, window_bounds = array<i64: 8, 896>}, {pipeline_mode = #tpu.pipeline_mode<synchronous>, transform_indices = @transform_1, window_bounds = array<i64: 896, 128>}, {pipeline_mode = #tpu.pipeline_mode<synchronous>, transform_indices = @transform_2, window_bounds = array<i64: 1, 128>}, {pipeline_mode = #tpu.pipeline_mode<synchronous>, transform_indices = @transform_3, window_bounds = array<i64: 128, 128>}, {pipeline_mode = #tpu.pipeline_mode<synchronous>, transform_indices = @transform_4, window_bounds = array<i64: 1, 128>}, {pipeline_mode = #tpu.pipeline_mode<synchronous>, transform_indices = @transform_5, window_bounds = array<i64: 128, 128>}, {pipeline_mode = #tpu.pipeline_mode<synchronous>, transform_indices = @transform_6, window_bounds = array<i64: 1, 128>}, {transform_indices = @transform_7, window_bounds = array<i64: 8, 128>}]} {
    %c0 = arith.constant 0 : index
    %c0_0 = arith.constant 0 : index
    %0 = vector.load %arg1[%c0, %c0_0] : memref<8x896xbf16, #tpu.memory_space<vmem>>, vector<8x896xbf16>
    %c0_1 = arith.constant 0 : index
    %c0_2 = arith.constant 0 : index
    %1 = vector.load %arg2[%c0_1, %c0_2] : memref<896x128xbf16, #tpu.memory_space<vmem>>, vector<896x128xbf16>
    %cst = arith.constant dense<0.000000e+00> : vector<8x128xf32>
    %2 = tpu.matmul %0, %1, %cst {dimension_numbers = #tpu.dot_dimension_numbers<[1], [0], [0], [1], [0, 0, 1, 1], [], []>} : vector<8x896xbf16>, vector<896x128xbf16>, vector<8x128xf32> -> vector<8x128xf32>
    %c0_3 = arith.constant 0 : index
    %c0_4 = arith.constant 0 : index
    %3 = vector.load %arg3[%c0_3, %c0_4] : memref<1x128xf32, #tpu.memory_space<vmem>>, vector<1x128xf32>
    %4 = vector.broadcast %3 : vector<1x128xf32> to vector<8x128xf32>
    %5 = arith.addf %2, %4 : vector<8x128xf32>
    %cst_5 = arith.constant 0.000000e+00 : f32
    %6 = vector.broadcast %cst_5 : f32 to vector<8x128xf32>
    %7 = arith.maximumf %5, %6 : vector<8x128xf32>
    %8 = arith.truncf %7 : vector<8x128xf32> to vector<8x128xbf16>
    %c0_6 = arith.constant 0 : index
    %c0_7 = arith.constant 0 : index
    %9 = vector.load %arg4[%c0_6, %c0_7] : memref<128x128xbf16, #tpu.memory_space<vmem>>, vector<128x128xbf16>
    %cst_8 = arith.constant dense<0.000000e+00> : vector<8x128xf32>
    %10 = tpu.matmul %8, %9, %cst_8 {dimension_numbers = #tpu.dot_dimension_numbers<[1], [0], [0], [1], [0, 0, 1, 1], [], []>} : vector<8x128xbf16>, vector<128x128xbf16>, vector<8x128xf32> -> vector<8x128xf32>
    %c0_9 = arith.constant 0 : index
    %c0_10 = arith.constant 0 : index
    %11 = vector.load %arg5[%c0_9, %c0_10] : memref<1x128xf32, #tpu.memory_space<vmem>>, vector<1x128xf32>
    %12 = vector.broadcast %11 : vector<1x128xf32> to vector<8x128xf32>
    %13 = arith.addf %10, %12 : vector<8x128xf32>
    %cst_11 = arith.constant 0.000000e+00 : f32
    %14 = vector.broadcast %cst_11 : f32 to vector<8x128xf32>
    %15 = arith.maximumf %13, %14 : vector<8x128xf32>
    %16 = arith.truncf %15 : vector<8x128xf32> to vector<8x128xbf16>
    %c0_12 = arith.constant 0 : index
    %c0_13 = arith.constant 0 : index
    %17 = vector.load %arg6[%c0_12, %c0_13] : memref<128x128xbf16, #tpu.memory_space<vmem>>, vector<128x128xbf16>
    %cst_14 = arith.constant dense<0.000000e+00> : vector<8x128xf32>
    %18 = tpu.matmul %16, %17, %cst_14 {dimension_numbers = #tpu.dot_dimension_numbers<[1], [0], [0], [1], [0, 0, 1, 1], [], []>} : vector<8x128xbf16>, vector<128x128xbf16>, vector<8x128xf32> -> vector<8x128xf32>
    %c0_15 = arith.constant 0 : index
    %c0_16 = arith.constant 0 : index
    %19 = vector.load %arg7[%c0_15, %c0_16] : memref<1x128xf32, #tpu.memory_space<vmem>>, vector<1x128xf32>
    %20 = vector.broadcast %19 : vector<1x128xf32> to vector<8x128xf32>
    %21 = arith.addf %18, %20 : vector<8x128xf32>
    %cst_17 = arith.constant 0.000000e+00 : f32
    %22 = vector.broadcast %cst_17 : f32 to vector<8x128xf32>
    %23 = arith.maximumf %21, %22 : vector<8x128xf32>
    %c0_18 = arith.constant 0 : index
    %c0_19 = arith.constant 0 : index
    %24 = vector.load %arg8[%c0_18, %c0_19] : memref<8x128xf32, #tpu.memory_space<vmem>>, vector<8x128xf32>
    tpu.vector_store %arg8[%c0_18, %c0_19], %23 {strides = array<i32>} : memref<8x128xf32, #tpu.memory_space<vmem>>, vector<8x128xf32>,
    return
  }
  func.func @transform_0(%arg0: i32) -> (i32, i32) {
    %c0_i32 = arith.constant 0 : i32
    %c0_i32_0 = arith.constant 0 : i32
    return %arg0, %c0_i32 : i32, i32
  }
  func.func @transform_1(%arg0: i32) -> (i32, i32) {
    %c0_i32 = arith.constant 0 : i32
    %c0_i32_0 = arith.constant 0 : i32
    %c0_i32_1 = arith.constant 0 : i32
    return %c0_i32, %c0_i32_0 : i32, i32
  }
  func.func @transform_2(%arg0: i32) -> (i32, i32) {
    %c0_i32 = arith.constant 0 : i32
    %c0_i32_0 = arith.constant 0 : i32
    %c0_i32_1 = arith.constant 0 : i32
    return %c0_i32, %c0_i32_0 : i32, i32
  }
  func.func @transform_3(%arg0: i32) -> (i32, i32) {
    %c0_i32 = arith.constant 0 : i32
    %c0_i32_0 = arith.constant 0 : i32
    %c0_i32_1 = arith.constant 0 : i32
    return %c0_i32, %c0_i32_0 : i32, i32
  }
  func.func @transform_4(%arg0: i32) -> (i32, i32) {
    %c0_i32 = arith.constant 0 : i32
    %c0_i32_0 = arith.constant 0 : i32
    %c0_i32_1 = arith.constant 0 : i32
    return %c0_i32, %c0_i32_0 : i32, i32
  }
  func.func @transform_5(%arg0: i32) -> (i32, i32) {
    %c0_i32 = arith.constant 0 : i32
    %c0_i32_0 = arith.constant 0 : i32
    %c0_i32_1 = arith.constant 0 : i32
    return %c0_i32, %c0_i32_0 : i32, i32
  }
  func.func @transform_6(%arg0: i32) -> (i32, i32) {
    %c0_i32 = arith.constant 0 : i32
    %c0_i32_0 = arith.constant 0 : i32
    %c0_i32_1 = arith.constant 0 : i32
    return %c0_i32, %c0_i32_0 : i32, i32
  }
  func.func @transform_7(%arg0: i32) -> (i32, i32) {
    %c0_i32 = arith.constant 0 : i32
    %c0_i32_0 = arith.constant 0 : i32
    return %arg0, %c0_i32 : i32, i32
  }
}

</mosaic_0001>

<bundles_post_ra>
// kernel: student_net_forward.1
= control target key start
LH: loop header
LB: loop body
LE: loop exit
PB: predicated region body
PF: predicated region fallthrough
CT: control target
= control target key end

     0   :  { %v1219_v39 = vmov 0.0   ;;  %vm1220_vm0 = vmmov 0   ;;  %s1531_s1 = inlined_call_operand.vmem [shape: bf16[896,128], index: 1, kind: input, shape index: {}]   ;;  %s1532_s0 = inlined_call_operand.vmem [shape: bf16[8,896], index: 0, kind: input, shape index: {}]   ;;  %s1533_s3 = inlined_call_operand.vmem [shape: bf16[128,128], index: 3, kind: input, shape index: {}]   ;;  %s1534_s5 = inlined_call_operand.vmem [shape: bf16[128,128], index: 5, kind: input, shape index: {}]   ;;  %s1535_s2 = inlined_call_operand.vmem [shape: f32[1,128], index: 2, kind: input, shape index: {}]   ;;  %s1536_s4 = inlined_call_operand.vmem [shape: f32[1,128], index: 4, kind: input, shape index: {}]   ;;  %s1537_s6 = inlined_call_operand.vmem [shape: f32[1,128], index: 6, kind: input, shape index: {}]   ;;  %s1538_s7 = inlined_call_operand.vmem [shape: f32[8,128], index: 7, kind: output, shape index: {}]  }
   0x1   :  { %v1140_v0 = vld [vmem:[%s1531_s1 + $0x78] sm:$0xff]   ;;  %v1144_v4 = vld [vmem:[%s1531_s1 + $0x70] sm:$0xff]   ;;  %v1148_v8 = vld [vmem:[%s1531_s1 + $0x68] sm:$0xff]  }
   0x2   :  { %v1141_v1 = vld [vmem:[%s1531_s1 + $0xf8] sm:$0xff]   ;;  %985 = vmatprep.subr.bf16.mxu0 %v1140_v0  ;;  %v1145_v5 = vld [vmem:[%s1531_s1 + $0xf0] sm:$0xff]   ;;  %v1149_v9 = vld [vmem:[%s1531_s1 + $0xe8] sm:$0xff]  }
   0x3   :  { %v1142_v2 = vld [vmem:[%s1531_s1 + $0x38] sm:$0xff]   ;;  %1007 = vmatprep.subr.bf16.mxu1 %v1141_v1  ;;  %v1146_v6 = vld [vmem:[%s1531_s1 + $0x30] sm:$0xff]   ;;  %v1150_v10 = vld [vmem:[%s1531_s1 + $0x28] sm:$0xff]  }
   0x4   :  { %v1143_v3 = vld [vmem:[%s1531_s1 + $0xb8] sm:$0xff]   ;;  %986 = vmatpush3.bf16.msra.mxu0 %v1142_v2  ;;  %v1147_v7 = vld [vmem:[%s1531_s1 + $0xb0] sm:$0xff]   ;;  %v1151_v11 = vld [vmem:[%s1531_s1 + $0xa8] sm:$0xff]  }
   0x5   :  { %1008 = vmatpush3.bf16.msra.mxu1 %v1143_v3  ;;  %987 = vmatprep.subr.bf16.mxu0 %v1144_v4  ;;  %v1152_v12 = vld [vmem:[%s1531_s1 + $0x60] sm:$0xff]   ;;  %v1156_v16 = vld [vmem:[%s1531_s1 + $0x58] sm:$0xff]   ;;  %v1160_v20 = vld [vmem:[%s1531_s1 + $0x50] sm:$0xff]  }
   0x6   :  { %1009 = vmatprep.subr.bf16.mxu1 %v1145_v5  ;;  %v1153_v13 = vld [vmem:[%s1531_s1 + $0xe0] sm:$0xff]   ;;  %v1157_v17 = vld [vmem:[%s1531_s1 + $0xd8] sm:$0xff]   ;;  %v1161_v21 = vld [vmem:[%s1531_s1 + $0xd0] sm:$0xff]  }
   0x7   :  { %v1154_v14 = vld [vmem:[%s1531_s1 + $0x20] sm:$0xff]   ;;  %v1158_v18 = vld [vmem:[%s1531_s1 + $0x18] sm:$0xff]   ;;  %v1162_v22 = vld [vmem:[%s1531_s1 + $0x10] sm:$0xff]  }
   0x8   :  { %988 = vmatpush3.bf16.msra.mxu0 %v1146_v6  ;;  %v1155_v15 = vld [vmem:[%s1531_s1 + $0xa0] sm:$0xff]   ;;  %v1159_v19 = vld [vmem:[%s1531_s1 + $0x98] sm:$0xff]   ;;  %v1163_v23 = vld [vmem:[%s1531_s1 + $0x90] sm:$0xff]  }
   0x9   :  { %1010 = vmatpush3.bf16.msra.mxu1 %v1147_v7  ;;  %989 = vmatprep.subr.bf16.mxu0 %v1148_v8  ;;  %v1164_v24 = vld [vmem:[%s1531_s1 + $0x48] sm:$0xff]   ;;  %v1168_v28 = vld [vmem:[%s1531_s1 + $0x40] sm:$0xff]   ;;  %v1176_v38 = vld [vmem:[%s1531_s1 + $0x178] sm:$0xff]  }
   0xa   :  { %1011 = vmatprep.subr.bf16.mxu1 %v1149_v9  ;;  %v1165_v25 = vld [vmem:[%s1531_s1 + $0xc8] sm:$0xff]   ;;  %v1169_v29 = vld [vmem:[%s1531_s1 + $0xc0] sm:$0xff]   ;;  %v1177_v40 = vld [vmem:[%s1531_s1 + $0x138] sm:$0xff]  }
   0xb   :  { %v1166_v26 = vld [vmem:[%s1531_s1 + $0x8] sm:$0xff]   ;;  %v1170_v30 = vld [vmem:[%s1531_s1] sm:$0xff]   ;;  %v1178_v41 = vld [vmem:[%s1531_s1 + $0x1b8] sm:$0xff]  }
   0xc   :  { %990 = vmatpush3.bf16.msra.mxu0 %v1150_v10  ;;  %v1167_v27 = vld [vmem:[%s1531_s1 + $0x88] sm:$0xff]   ;;  %v1171_v31 = vld [vmem:[%s1531_s1 + $0x80] sm:$0xff]   ;;  %v1179_v42 = vld [vmem:[%s1531_s1 + $0x170] sm:$0xff]  }
   0xd   :  { %1012 = vmatpush3.bf16.msra.mxu1 %v1151_v11  ;;  %991 = vmatprep.subr.bf16.mxu0 %v1152_v12  ;;  %v27_v32 = vld [vmem:[%s1532_s0] sm:$0xff]  ;;  %v28_v33 = vld [vmem:[%s1532_s0 + $0x8] sm:$0xff]  ;;  %v1180_v43 = vld [vmem:[%s1531_s1 + $0x130] sm:$0xff]  }
   0xe   :  { %1013 = vmatprep.subr.bf16.mxu1 %v1153_v13  ;;  %v904_v34 = vcombine.low %v27_v32, %v27_v32  ;;  %v905_v35 = vcombine.high %v27_v32, %v27_v32  ;;  %v906_v36 = vcombine.low %v28_v33, %v28_v33  ;;  %v907_v37 = vcombine.high %v28_v33, %v28_v33  ;;  %v1181_v44 = vld [vmem:[%s1531_s1 + $0x1b0] sm:$0xff]   ;;  %v1182_v45 = vld [vmem:[%s1531_s1 + $0x168] sm:$0xff]   ;;  %v1185_v48 = vld [vmem:[%s1531_s1 + $0x160] sm:$0xff]  }
   0xf   :  { %v1183_v46 = vld [vmem:[%s1531_s1 + $0x128] sm:$0xff]   ;;  %v1186_v49 = vld [vmem:[%s1531_s1 + $0x120] sm:$0xff]   ;;  %v1188_v51 = vld [vmem:[%s1531_s1 + $0x158] sm:$0xff]  }
  0x10   :  { %992 = vmatpush3.bf16.msra.mxu0 %v1154_v14  ;;  %543 = vmatprep.mubr.bf16.mxu0 %v905_v35  ;;  %v1184_v47 = vld [vmem:[%s1531_s1 + $0x1a8] sm:$0xff]   ;;  %v1187_v50 = vld [vmem:[%s1531_s1 + $0x1a0] sm:$0xff]   ;;  %v1189_v52 = vld [vmem:[%s1531_s1 + $0x118] sm:$0xff]  }
  0x11   :  { %1014 = vmatpush3.bf16.msra.mxu1 %v1155_v15  ;;  %993 = vmatprep.subr.bf16.mxu0 %v1156_v16  ;;  %v1190_v53 = vld [vmem:[%s1531_s1 + $0x198] sm:$0xff]   ;;  %v1191_v54 = vld [vmem:[%s1531_s1 + $0x150] sm:$0xff]   ;;  %v1194_v57 = vld [vmem:[%s1531_s1 + $0x148] sm:$0xff]  }
  0x12   :  { %1015 = vmatprep.subr.bf16.mxu1 %v1157_v17  ;;  %583 = vmatprep.mubr.bf16.mxu1 %v907_v37  ;;  %v1192_v55 = vld [vmem:[%s1531_s1 + $0x110] sm:$0xff]   ;;  %v1195_v59 = vld [vmem:[%s1531_s1 + $0x108] sm:$0xff]   ;;  %v1197_v62 = vld [vmem:[%s1531_s1 + $0x140] sm:$0xff]  }
  0x13   :  { %v1193_v56 = vld [vmem:[%s1531_s1 + $0x190] sm:$0xff]   ;;  %v1196_v61 = vld [vmem:[%s1531_s1 + $0x188] sm:$0xff]   ;;  %v1198_v63 = vld [vmem:[%s1531_s1 + $0x100] sm:$0xff]  }
  0x14   :  { %994 = vmatpush3.bf16.msra.mxu0 %v1158_v18  ;;  %v29_v58 = vld [vmem:[%s1532_s0 + $0x10] sm:$0xff]  ;;  %v1199_v0 = vld [vmem:[%s1531_s1 + $0x180] sm:$0xff]   ;;  %v1202_v2 = vld [vmem:[%s1532_s0 + $0x18] ss:$0 sps:$4 sm:$0xff]  }
  0x15   :  { %1016 = vmatpush3.bf16.msra.mxu1 %v1159_v19  ;;  %995 = vmatprep.subr.bf16.mxu0 %v1160_v20  ;;  %v909_v60 = vcombine.high %v29_v58, %v29_v58  ;;  %v908_v1 = vcombine.low %v29_v58, %v29_v58  ;;  %v1203_v3 = vld [vmem:[%s1533_s3 + $0x38] sm:$0xff]   ;;  %v1204_v4 = vld [vmem:[%s1533_s3 + $0x30] sm:$0xff]   ;;  %v1205_v5 = vld [vmem:[%s1533_s3 + $0x28] sm:$0xff]  }
  0x16   :  { %1017 = vmatprep.subr.bf16.mxu1 %v1161_v21  ;;  %v1206_v6 = vld [vmem:[%s1533_s3 + $0x20] sm:$0xff]   ;;  %v1207_v7 = vld [vmem:[%s1533_s3 + $0x18] sm:$0xff]   ;;  %v1208_v8 = vld [vmem:[%s1533_s3 + $0x10] sm:$0xff]  }
  0x17   :  { %v1209_v9 = vld [vmem:[%s1533_s3 + $0x8] sm:$0xff]   ;;  %v1210_v10 = vld [vmem:[%s1533_s3] sm:$0xff]   ;;  %v1211_v11 = vld [vmem:[%s1534_s5 + $0x38] sm:$0xff]  }
  0x18   :  { %996 = vmatpush3.bf16.msra.mxu0 %v1162_v22  ;;  %v1212_v12 = vld [vmem:[%s1534_s5 + $0x30] sm:$0xff]   ;;  %v1213_v13 = vld [vmem:[%s1534_s5 + $0x28] sm:$0xff]   ;;  %v1214_v14 = vld [vmem:[%s1534_s5 + $0x20] sm:$0xff]  }
  0x19   :  { %1018 = vmatpush3.bf16.msra.mxu1 %v1163_v23  ;;  %997 = vmatprep.subr.bf16.mxu0 %v1164_v24  ;;  %v1215_v15 = vld [vmem:[%s1534_s5 + $0x18] sm:$0xff]   ;;  %v1216_v16 = vld [vmem:[%s1534_s5 + $0x10] sm:$0xff]  }
  0x1a   :  { %1019 = vmatprep.subr.bf16.mxu1 %v1165_v25 }
  0x1c   :  { %998 = vmatpush3.bf16.msra.mxu0 %v1166_v26  ;;  %v903_v26 = vld [vmem:[%s1535_s2] ss:$0 sm:$0xff] }
  0x1d   :  { %1020 = vmatpush3.bf16.msra.mxu1 %v1167_v27  ;;  %999 = vmatprep.subr.bf16.mxu0 %v1168_v28 }
  0x1e   :  { %1021 = vmatprep.subr.bf16.mxu1 %v1169_v29 }
  0x20   :  { %1000 = vmatpush3.bf16.msra.mxu0 %v1170_v30 }
  0x21   :  { %1022 = vmatpush3.bf16.msra.mxu1 %v1171_v31  ;;  %1029 = vmatprep.subr.bf16.mxu0 %v1176_v38 }
  0x22   :  { %1078 = vmatprep.subr.bf16.mxu1 %v1219_v39 }
  0x23   :  { %544 = vmatmul.mubr.bf16.vlgmr.msra.gmra.mxu0 %v904_v34 }
  0x24   :  { %584 = vmatmul.mubr.bf16.vlgmr.msra.gmra.mxu1 %v906_v36  ;;  %1030 = vmatpush3.bf16.msra.mxu0 %v1177_v40 }
  0x25   :  { %1079 = vmatpush3.bf16.msra.mxu1 %v1178_v41  ;;  %1031 = vmatprep.subr.bf16.mxu0 %v1179_v42 }
  0x26   :  { %1080 = vmatprep.subr.bf16.mxu1 %v1219_v39  ;;  %1094 = vmatprep.mubr.msk.bf16.mxu1 %vm1220_vm0, %v1219_v39 }
  0x27   :  { %623 = vmatprep.mubr.bf16.mxu0 %v909_v60 }
  0x28   :  { %1032 = vmatpush3.bf16.msra.mxu0 %v1180_v43 }
  0x29   :  { %1081 = vmatpush3.bf16.msra.mxu1 %v1181_v44  ;;  %1033 = vmatprep.subr.bf16.mxu0 %v1182_v45  ;;  %v1217_v44 = vld [vmem:[%s1534_s5 + $0x8] sm:$0xff]   ;;  %v1218_v45 = vld [vmem:[%s1534_s5] sm:$0xff]  }
  0x2a   :  { %1082 = vmatprep.subr.bf16.mxu1 %v1219_v39 }
  0x2c   :  { %1034 = vmatpush3.bf16.msra.mxu0 %v1183_v46  ;;  %v967_v46 = vld [vmem:[%s1536_s4] ss:$0 sm:$0xff] }
  0x2d   :  { %1083 = vmatpush3.bf16.msra.mxu1 %v1184_v47  ;;  %1035 = vmatprep.subr.bf16.mxu0 %v1185_v48 }
  0x2e   :  { %1084 = vmatprep.subr.bf16.mxu1 %v1219_v39 }
  0x30   :  { %1036 = vmatpush3.bf16.msra.mxu0 %v1186_v49 }
  0x31   :  { %1085 = vmatpush3.bf16.msra.mxu1 %v1187_v50  ;;  %1037 = vmatprep.subr.bf16.mxu0 %v1188_v51 }
  0x32   :  { %1086 = vmatprep.subr.bf16.mxu1 %v1219_v39 }
  0x34   :  { %1038 = vmatpush3.bf16.msra.mxu0 %v1189_v52 }
  0x35   :  { %1087 = vmatpush3.bf16.msra.mxu1 %v1190_v53  ;;  %1039 = vmatprep.subr.bf16.mxu0 %v1191_v54 }
  0x36   :  { %1088 = vmatprep.subr.bf16.mxu1 %v1219_v39 }
  0x38   :  { %1040 = vmatpush3.bf16.msra.mxu0 %v1192_v55 }
  0x39   :  { %1089 = vmatpush3.bf16.msra.mxu1 %v1193_v56  ;;  %1041 = vmatprep.subr.bf16.mxu0 %v1194_v57 }
  0x3a   :  { %1090 = vmatprep.subr.bf16.mxu1 %v1219_v39 }
  0x3c   :  { %1042 = vmatpush3.bf16.msra.mxu0 %v1195_v59 }
  0x3d   :  { %1091 = vmatpush3.bf16.msra.mxu1 %v1196_v61  ;;  %1043 = vmatprep.subr.bf16.mxu0 %v1197_v62 }
  0x3e   :  { %1092 = vmatprep.subr.bf16.mxu1 %v1219_v39 }
  0x40   :  { %1044 = vmatpush3.bf16.msra.mxu0 %v1198_v63 }
  0x41   :  { %1093 = vmatpush3.bf16.msra.mxu1 %v1199_v0  ;;  %1098 = vmatprep.subr.bf16.mxu0 %v1219_v39 }
  0x42   :  { %1118 = vmatprep.subr.bf16.mxu1 %v1219_v39 }
  0x43   :  { %624 = vmatmul.mubr.bf16.vlgmr.msra.gmra.mxu0 %v908_v1 }
  0x44   :  { %1095 = vmatmul.mubr.bf16.vlgmr.msra.gmra.mxu1 %v1202_v2  ;;  %1114 = vmatprep.mubr.msk.bf16.mxu0 %vm1220_vm0, %v1219_v39 }
  0x45   :  { %1134 = vmatprep.mubr.msk.bf16.mxu1 %vm1220_vm0, %v1219_v39  ;;  %1099 = vmatpush3.bf16.msra.mxu0 %v1203_v3 }
  0x46   :  { %1100 = vmatprep.subr.bf16.mxu0 %v1219_v39  ;;  %1119 = vmatpush3.bf16.msra.mxu1 %v1211_v11 }
  0x47   :  { %1120 = vmatprep.subr.bf16.mxu1 %v1219_v39 }
  0x49   :  { %1101 = vmatpush3.bf16.msra.mxu0 %v1204_v4 }
  0x4a   :  { %1102 = vmatprep.subr.bf16.mxu0 %v1219_v39  ;;  %1121 = vmatpush3.bf16.msra.mxu1 %v1212_v12 }
  0x4b   :  { %1122 = vmatprep.subr.bf16.mxu1 %v1219_v39 }
  0x4d   :  { %1103 = vmatpush3.bf16.msra.mxu0 %v1205_v5 }
  0x4e   :  { %1104 = vmatprep.subr.bf16.mxu0 %v1219_v39  ;;  %1123 = vmatpush3.bf16.msra.mxu1 %v1213_v13 }
  0x4f   :  { %1124 = vmatprep.subr.bf16.mxu1 %v1219_v39 }
  0x51   :  { %1105 = vmatpush3.bf16.msra.mxu0 %v1206_v6 }
  0x52   :  { %1106 = vmatprep.subr.bf16.mxu0 %v1219_v39  ;;  %1125 = vmatpush3.bf16.msra.mxu1 %v1214_v14 }
  0x53   :  { %1126 = vmatprep.subr.bf16.mxu1 %v1219_v39 }
  0x55   :  { %1107 = vmatpush3.bf16.msra.mxu0 %v1207_v7 }
  0x56   :  { %1108 = vmatprep.subr.bf16.mxu0 %v1219_v39  ;;  %1127 = vmatpush3.bf16.msra.mxu1 %v1215_v15 }
  0x57   :  { %1128 = vmatprep.subr.bf16.mxu1 %v1219_v39 }
  0x59   :  { %1109 = vmatpush3.bf16.msra.mxu0 %v1208_v8 }
  0x5a   :  { %1110 = vmatprep.subr.bf16.mxu0 %v1219_v39  ;;  %1129 = vmatpush3.bf16.msra.mxu1 %v1216_v16 }
  0x5b   :  { %1130 = vmatprep.subr.bf16.mxu1 %v1219_v39 }
  0x5d   :  { %1111 = vmatpush3.bf16.msra.mxu0 %v1209_v9 }
  0x5e   :  { %1112 = vmatprep.subr.bf16.mxu0 %v1219_v39  ;;  %1131 = vmatpush3.bf16.msra.mxu1 %v1217_v44 }
  0x5f   :  { %1132 = vmatprep.subr.bf16.mxu1 %v1219_v39  ;;  %v976_v39 = vld [vmem:[%s1537_s6] ss:$0 sm:$0xff] }
  0x61   :  { %1113 = vmatpush3.bf16.msra.mxu0 %v1210_v10 }
  0x62   :  { %1133 = vmatpush3.bf16.msra.mxu1 %v1218_v45 }
  0xe3   :  { %v1001_v17 = vpop.f32.mrf.mxu0 }
  0xe4   :  { %v1023_v18 = vpop.f32.mrf.mxu1 }
  0xe5   :  { %v1002_v19 = vpop.f32.mrf.mxu0 }
  0xe6   :  { %v1024_v20 = vpop.f32.mrf.mxu1  ;;  %v1003_v25 = vadd.f32 %v1002_v19, %v1001_v17 }
  0xe7   :  { %v1004_v21 = vpop.f32.mrf.mxu0  ;;  %v1025_v28 = vadd.f32 %v1024_v20, %v1023_v18 }
  0xe8   :  { %v1026_v22 = vpop.f32.mrf.mxu1  ;;  %v546_v27 = vadd.f32 %v1003_v25, %v903_v26 }
  0xe9   :  { %v1005_v23 = vpop.f32.mrf.mxu0 }
  0xea   :  { %v1027_v24 = vpop.f32.mrf.mxu1  ;;  %v586_v32 = vadd.f32 %v1025_v28, %v546_v27 }
 0x103   :  { %v1045_v29 = vpop.f32.mrf.mxu0 }
 0x104   :  { %v665_v30 = vpop.f32.mrf.mxu1 }
 0x105   :  { %v1046_v31 = vpop.f32.mrf.mxu0 }
 0x106   :  { %v1047_v33 = vadd.f32 %v1046_v31, %v1045_v29  ;;  %v1096_v34 = vpop.f32.mrf.mxu1 }
 0x107   :  { %v1048_v35 = vpop.f32.mrf.mxu0 }
 0x108   :  { %v626_v36 = vadd.f32 %v1047_v33, %v586_v32  ;;  %v668_v37 = vpop.f32.mrf.mxu1 }
 0x109   :  { %v1049_v38 = vpop.f32.mrf.mxu0 }
 0x10a   :  { %v666_v40 = vadd.f32 %v665_v30, %v626_v36  ;;  %v1097_v41 = vpop.f32.mrf.mxu1 }
 0x10c   :  { %v671_v42 = vmax.f32 %v666_v40, 0.0 }
 0x10e   :  { %v672_v43 = vpack.c.bf16 %v671_v42, %v671_v42 }
 0x110   :  { %1115 = vmatmul.mubr.bf16.vlgmr.msra.gmra.mxu0 %v672_v43 }
 0x1d0   :  { %v778_v47 = vpop.f32.mrf.mxu0 }
 0x1d1   :  { %v779_v48 = vadd.f32 %v967_v46, %v778_v47 }
 0x1d2   :  { %v1116_v49 = vpop.f32.mrf.mxu0 }
 0x1d3   :  { %v784_v50 = vmax.f32 %v779_v48, 0.0 }
 0x1d4   :  { %v781_v51 = vpop.f32.mrf.mxu0 }
 0x1d5   :  { %v785_v52 = vpack.c.bf16 %v784_v50, %v784_v50 }
 0x1d6   :  { %v1117_v53 = vpop.f32.mrf.mxu0 }
 0x1d7   :  { %1135 = vmatmul.mubr.bf16.vlgmr.msra.gmra.mxu1 %v785_v52 }
 0x297   :  { %v891_v54 = vpop.f32.mrf.mxu1 }
 0x298   :  { %v892_v55 = vadd.f32 %v976_v39, %v891_v54 }
 0x299   :  { %v1136_v56 = vpop.f32.mrf.mxu1 }
 0x29a   :  { %v897_v57 = vmax.f32 %v892_v55, 0.0 }
 0x29b   :  { %v894_v58 = vpop.f32.mrf.mxu1 }
 0x29c   :  { %898 = vst [vmem:[%s1538_s7] sm:$0xff] %v897_v57 }
 0x29d   :  { %v1137_v59 = vpop.f32.mrf.mxu1 }

</bundles_post_ra>
